<compile_context>
chip_gen: v7x
topology: tpu7x:2x2x1
jax: 0.10.0
libtpu: 0.0.40
codegen_flags: <defaults>
</compile_context>

<pallas_src>
import functools
import math

import jax
import jax.numpy as jnp
from jax import lax
from jax.experimental import pallas as pl
from jax.experimental.pallas import tpu as pltpu


def _round_up(a, m):
    return (a + m - 1) // m * m


def _sublane(dtype):
    # dtype-aware sublane multiple: f32 -> 8, bf16 -> 16, int8/fp8 -> 32.
    return {4: 8, 2: 16, 1: 32}[jnp.dtype(dtype).itemsize]


def _col_tile(n):
    # Lane-dense (multiple of 128) column tile giving >= 2 column blocks when
    # possible, so both v7x TensorCores get work even with a single row tile.
    if n % 256 == 0 and n >= 512:
        return 256
    if n % 128 == 0 and n >= 256:
        return 128
    return n


# ---------------------------------------------------------------------------
# Linear: out = x @ w + b, tiled over rows and output columns. bf16 MXU inputs,
# f32 accumulation, f32 bias add, cast to out dtype.
# ---------------------------------------------------------------------------
def _linear_kernel(x_ref, w_ref, b_ref, o_ref):
    acc = jnp.dot(x_ref[...], w_ref[...], preferred_element_type=jnp.float32)
    o_ref[...] = (acc + b_ref[...]).astype(o_ref.dtype)


def linear_pallas(x2, w, b, *, out_dtype=None, tm=256):
    """x2: [M, D], w: [D, N] (transposed vs. nn.Linear), b: [N] -> [M, N]."""
    M, D = x2.shape
    N = w.shape[1]
    out_dtype = out_dtype if out_dtype is not None else x2.dtype

    tm = min(tm, _round_up(M, _sublane(x2.dtype)))
    Mp = _round_up(M, tm)
    if Mp != M:
        x2 = jnp.pad(x2, ((0, Mp - M), (0, 0)))
    tn = _col_tile(N)

    b2 = b.reshape(1, N).astype(jnp.float32)
    cost = pl.CostEstimate(
        flops=2 * Mp * D * N,
        transcendentals=0,
        bytes_accessed=(Mp * D * x2.dtype.itemsize + D * N * w.dtype.itemsize
                        + N * 4 + Mp * N * jnp.dtype(out_dtype).itemsize),
    )

    out = pl.pallas_call(
        _linear_kernel,
        out_shape=jax.ShapeDtypeStruct((Mp, N), out_dtype),
        grid_spec=pltpu.PrefetchScalarGridSpec(
            num_scalar_prefetch=0,
            grid=(Mp // tm, N // tn),
            in_specs=[
                pl.BlockSpec((tm, D), lambda i, j: (i, 0)),   # activation rows
                pl.BlockSpec((D, tn), lambda i, j: (0, j)),   # weight column block
                pl.BlockSpec((1, tn), lambda i, j: (0, j)),   # bias column block
            ],
            out_specs=pl.BlockSpec((tm, tn), lambda i, j: (i, j)),
        ),
        compiler_params=pltpu.CompilerParams(
            dimension_semantics=("parallel", "parallel"),
        ),
        cost_estimate=cost,
    )(x2, w, b2)

    return out[:M]


# ---------------------------------------------------------------------------
# Fused attention + output projection. One batch element per grid step, all
# heads computed per step (static unroll). q: [B, L, C], kv: [B, Lcp, 2C]
# (first C columns = k, last C columns = v), bias: [B, 1, Lcp] additive.
# ---------------------------------------------------------------------------
def _attn_proj_body(q_ref, kv_ref, bias_ref, wp_ref, bp_ref, o_ref, attn_ref,
                    *, num_heads, head_dim, scale):
    C = num_heads * head_dim
    for h in range(num_heads):  # static unroll: heads batched per grid step
        q_h = q_ref[:, h * head_dim:(h + 1) * head_dim]              # (L, Dh)
        k_h = kv_ref[:, h * head_dim:(h + 1) * head_dim]             # (Lcp, Dh)
        v_h = kv_ref[:, C + h * head_dim:C + (h + 1) * head_dim]     # (Lcp, Dh)
        # s = q @ k^T, bf16 MXU inputs, f32 accumulation.
        s = lax.dot_general(q_h, k_h, (((1,), (1,)), ((), ())),
                            preferred_element_type=jnp.float32)       # (L, Lcp)
        s = s * jnp.float32(scale)
        if bias_ref is not None:
            s = s + bias_ref[...]                                     # (1, Lcp)
        m = jnp.max(s, axis=-1, keepdims=True)
        p = jnp.exp(s - m)                                            # EUP
        l = jnp.sum(p, axis=-1, keepdims=True)
        o = jnp.dot(p.astype(kv_ref.dtype), v_h,
                    preferred_element_type=jnp.float32)               # (L, Dh)
        o = o * pl.reciprocal(l, approx=True)                         # EUP rcp
        attn_ref[:, h * head_dim:(h + 1) * head_dim] = o.astype(attn_ref.dtype)
    # Output projection fused in (proj weight resident in VMEM).
    acc = jnp.dot(attn_ref[...], wp_ref[...],
                  preferred_element_type=jnp.float32)
    o_ref[...] = (acc + bp_ref[...]).astype(o_ref.dtype)


def _attn_proj_kernel_bias(q_ref, kv_ref, bias_ref, wp_ref, bp_ref, o_ref,
                           attn_ref, **kw):
    _attn_proj_body(q_ref, kv_ref, bias_ref, wp_ref, bp_ref, o_ref, attn_ref,
                    **kw)


def _attn_proj_kernel_nobias(q_ref, kv_ref, wp_ref, bp_ref, o_ref,
                             attn_ref, **kw):
    _attn_proj_body(q_ref, kv_ref, None, wp_ref, bp_ref, o_ref, attn_ref, **kw)


def attention_proj_pallas(q, kv, bias3, wp, bp, *, num_heads, scale, out_dtype):
    B, L, C = q.shape
    Lcp = kv.shape[1]
    Dh = C // num_heads
    has_bias = bias3 is not None
    bp2 = bp.reshape(1, C).astype(jnp.float32)

    in_specs = [
        pl.BlockSpec((None, L, C), lambda b: (b, 0, 0)),          # q   [B,L,C]
        pl.BlockSpec((None, Lcp, 2 * C), lambda b: (b, 0, 0)),    # kv  [B,Lcp,2C]
    ]
    args = [q, kv]
    if has_bias:
        in_specs.append(pl.BlockSpec((None, 1, Lcp), lambda b: (b, 0, 0)))
        args.append(bias3)
    in_specs += [
        pl.BlockSpec((C, C), lambda b: (0, 0)),                   # proj weight
        pl.BlockSpec((1, C), lambda b: (0, 0)),                   # proj bias
    ]
    args += [wp, bp2]

    kernel = functools.partial(
        _attn_proj_kernel_bias if has_bias else _attn_proj_kernel_nobias,
        num_heads=num_heads, head_dim=Dh, scale=scale)

    cost = pl.CostEstimate(
        flops=4 * B * num_heads * L * Lcp * Dh + 2 * B * L * C * C,
        transcendentals=B * num_heads * L * Lcp,
        bytes_accessed=(q.size * q.dtype.itemsize + kv.size * kv.dtype.itemsize
                        + (bias3.size * 4 if has_bias else 0)
                        + wp.size * wp.dtype.itemsize + C * 4
                        + B * L * C * jnp.dtype(out_dtype).itemsize),
    )

    return pl.pallas_call(
        kernel,
        out_shape=jax.ShapeDtypeStruct((B, L, C), out_dtype),
        grid_spec=pltpu.PrefetchScalarGridSpec(
            num_scalar_prefetch=0,
            grid=(B,),
            in_specs=in_specs,
            out_specs=pl.BlockSpec((None, L, C), lambda b: (b, 0, 0)),
            scratch_shapes=[pltpu.VMEM((L, C), jnp.bfloat16)],
        ),
        compiler_params=pltpu.CompilerParams(
            dimension_semantics=("parallel",),
        ),
        cost_estimate=cost,
    )(*args)


# ---------------------------------------------------------------------------
# Full CrossAttention forward (qk_norm=False path, no kv cache, no dropout).
# ---------------------------------------------------------------------------
def cross_attention_pallas(x, context, params, *, num_heads,
                           context_attn_bias=None):
    B, L, C = x.shape
    Bc, Lc, Cc = context.shape
    assert B == Bc and C % num_heads == 0
    Dh = C // num_heads
    scale = 1.0 / math.sqrt(Dh)
    cdt = jnp.bfloat16  # MXU-native compute dtype; accumulation stays f32.

    wq, bq = params["to_q"]
    wkv, bkv = params["to_kv"]
    wp, bp = params["proj"]
    wq, wkv, wp = (w.astype(cdt) for w in (wq, wkv, wp))  # cast weights once

    # q projection; output stays bf16 and in [B, L, C] layout (no transposes).
    q = linear_pallas(x.astype(cdt).reshape(B * L, C), wq, bq,
                      out_dtype=cdt).reshape(B, L, C)

    # Pad the context length to a lane-dense multiple of 128 BEFORE to_kv so
    # scores / softmax / p@v are lane-dense; padded keys get a -1e9 bias.
    Lcp = _round_up(Lc, 128)
    ctx = context.astype(cdt)
    if Lcp != Lc:
        ctx = jnp.pad(ctx, ((0, 0), (0, Lcp - Lc), (0, 0)))
    kv = linear_pallas(ctx.reshape(B * Lcp, Cc), wkv, bkv,
                       out_dtype=cdt).reshape(B, Lcp, 2 * C)

    if context_attn_bias is None and Lcp == Lc:
        bias3 = None  # no-bias kernel variant: no zeros DMA / broadcast add
    else:
        base = (jnp.zeros((B, Lc), jnp.float32) if context_attn_bias is None
                else context_attn_bias.astype(jnp.float32))
        if Lcp != Lc:
            base = jnp.concatenate(
                [base, jnp.full((B, Lcp - Lc), -1e9, jnp.float32)], axis=1)
        bias3 = base.reshape(B, 1, Lcp)

    # Fused attention + output projection (proj_drop = Identity).
    return attention_proj_pallas(q, kv, bias3, wp, bp, num_heads=num_heads,
                                 scale=scale, out_dtype=x.dtype)


# ---------------------------------------------------------------------------
# Pure-JAX f32 reference (same math as the torch module, HIGHEST precision).
# ---------------------------------------------------------------------------
def cross_attention_ref(x, context, params, *, num_heads,
                        context_attn_bias=None):
    B, L, C = x.shape
    _, Lc, _ = context.shape
    Dh = C // num_heads
    scale = 1.0 / math.sqrt(Dh)
    hp = jax.lax.Precision.HIGHEST

    wq, bq = params["to_q"]
    wkv, bkv = params["to_kv"]
    wp, bp = params["proj"]

    q = jnp.einsum("blc,cd->bld", x, wq, precision=hp) + bq
    kv = jnp.einsum("blc,cd->bld", context, wkv, precision=hp) + bkv
    kv = kv.reshape(B, Lc, 2, C)
    k = kv[:, :, 0, :]
    v = kv[:, :, 1, :]

    q = q.reshape(B, L, num_heads, Dh).transpose(0, 2, 1, 3)
    k = k.reshape(B, Lc, num_heads, Dh).transpose(0, 2, 1, 3)
    v = v.reshape(B, Lc, num_heads, Dh).transpose(0, 2, 1, 3)

    s = jnp.einsum("bhld,bhkd->bhlk", q, k, precision=hp) * scale
    if context_attn_bias is not None:
        s = s + context_attn_bias[:, None, None, :]
    p = jax.nn.softmax(s, axis=-1)
    o = jnp.einsum("bhlk,bhkd->bhld", p, v, precision=hp)
    o = o.transpose(0, 2, 1, 3).reshape(B, L, C)
    return jnp.einsum("blc,cd->bld", o, wp, precision=hp) + bp


if __name__ == "__main__":
    key = jax.random.PRNGKey(0)

    # Small but lane-dense shapes: embed_dim=256, num_heads=2 -> head_dim=128.
    B, L, Lc = 2, 16, 32
    embed_dim, context_dim, num_heads = 256, 384, 2

    keys = jax.random.split(key, 8)
    b_q = 1.0 / math.sqrt(embed_dim)
    b_kv = 1.0 / math.sqrt(context_dim)

    # Weights stored [in, out] (transposed vs. nn.Linear).
    wq = jax.random.uniform(keys[0], (embed_dim, embed_dim), jnp.float32, -b_q, b_q)
    bq = jax.random.uniform(keys[1], (embed_dim,), jnp.float32, -b_q, b_q)
    wkv = jax.random.uniform(keys[2], (context_dim, 2 * embed_dim), jnp.float32,
                             -b_kv, b_kv)
    bkv = jax.random.uniform(keys[3], (2 * embed_dim,), jnp.float32, -b_kv, b_kv)
    wp = jax.random.uniform(keys[4], (embed_dim, embed_dim), jnp.float32, -b_q, b_q)
    bp = jax.random.uniform(keys[5], (embed_dim,), jnp.float32, -b_q, b_q)

    x = jax.random.normal(keys[6], (B, L, embed_dim), jnp.float32)
    context = jax.random.normal(keys[7], (B, Lc, context_dim), jnp.float32)
    # Additive attention bias (mask): batch 1 masks its last 8 context tokens.
    valid_len = jnp.array([[Lc], [Lc - 8]])
    context_attn_bias = jnp.where(jnp.arange(Lc)[None, :] < valid_len,
                                  0.0, -1e9).astype(jnp.float32)

    params = {"to_q": (wq, bq), "to_kv": (wkv, bkv), "proj": (wp, bp)}

    out = cross_attention_pallas(x, context, params, num_heads=num_heads,
                                 context_attn_bias=context_attn_bias)
    out = jax.block_until_ready(out)

    ref = cross_attention_ref(x, context, params, num_heads=num_heads,
                              context_attn_bias=context_attn_bias)

    assert out.shape == (B, L, embed_dim)
    err = float(jnp.max(jnp.abs(out - ref)))
    # bf16 MXU inputs with f32 accumulation vs. the f32 HIGHEST reference.
    assert jnp.allclose(out, ref, atol=2e-2, rtol=2e-2), err

    print("KERNEL_OK")
</pallas_src>

<mosaic_0001>
module attributes {stable_mosaic.version = 11 : i64} {
  func.func @_linear_kernel(%arg0: i32, %arg1: i32, %arg2: memref<32x256xbf16, #tpu.memory_space<vmem>>, %arg3: memref<256x128xbf16, #tpu.memory_space<vmem>>, %arg4: memref<1x128xf32, #tpu.memory_space<vmem>>, %arg5: memref<32x128xbf16, #tpu.memory_space<vmem>>) attributes {dimension_semantics = [#tpu.dimension_semantics<parallel>, #tpu.dimension_semantics<parallel>], iteration_bounds = array<i64: 1, 2>, scalar_prefetch = 0 : i64, scratch_operands = 0 : i64, tpu.core_type = #tpu.core_type<tc>, window_params = [{transform_indices = @transform_0, window_bounds = array<i64: 32, 256>}, {transform_indices = @transform_1, window_bounds = array<i64: 256, 128>}, {transform_indices = @transform_2, window_bounds = array<i64: 1, 128>}, {transform_indices = @transform_3, window_bounds = array<i64: 32, 128>}]} {
    %c0 = arith.constant 0 : index
    %c0_0 = arith.constant 0 : index
    %0 = vector.load %arg2[%c0, %c0_0] : memref<32x256xbf16, #tpu.memory_space<vmem>>, vector<32x256xbf16>
    %c0_1 = arith.constant 0 : index
    %c0_2 = arith.constant 0 : index
    %1 = vector.load %arg3[%c0_1, %c0_2] : memref<256x128xbf16, #tpu.memory_space<vmem>>, vector<256x128xbf16>
    %cst = arith.constant dense<0.000000e+00> : vector<32x128xf32>
    %2 = tpu.matmul %0, %1, %cst {dimension_numbers = #tpu.dot_dimension_numbers<[1], [0], [0], [1], [0, 0, 1, 1], [], []>} : vector<32x256xbf16>, vector<256x128xbf16>, vector<32x128xf32> -> vector<32x128xf32>
    %c0_3 = arith.constant 0 : index
    %c0_4 = arith.constant 0 : index
    %3 = vector.load %arg4[%c0_3, %c0_4] : memref<1x128xf32, #tpu.memory_space<vmem>>, vector<1x128xf32>
    %4 = vector.broadcast %3 : vector<1x128xf32> to vector<32x128xf32>
    %5 = arith.addf %2, %4 : vector<32x128xf32>
    %6 = arith.truncf %5 : vector<32x128xf32> to vector<32x128xbf16>
    %c0_5 = arith.constant 0 : index
    %c0_6 = arith.constant 0 : index
    %7 = vector.load %arg5[%c0_5, %c0_6] : memref<32x128xbf16, #tpu.memory_space<vmem>>, vector<32x128xbf16>
    tpu.vector_store %arg5[%c0_5, %c0_6], %6 {strides = array<i32>} : memref<32x128xbf16, #tpu.memory_space<vmem>>, vector<32x128xbf16>,
    return
  }
  func.func @transform_0(%arg0: i32, %arg1: i32) -> (i32, i32) {
    %c0_i32 = arith.constant 0 : i32
    %c0_i32_0 = arith.constant 0 : i32
    return %arg0, %c0_i32 : i32, i32
  }
  func.func @transform_1(%arg0: i32, %arg1: i32) -> (i32, i32) {
    %c0_i32 = arith.constant 0 : i32
    %c0_i32_0 = arith.constant 0 : i32
    return %c0_i32, %arg1 : i32, i32
  }
  func.func @transform_2(%arg0: i32, %arg1: i32) -> (i32, i32) {
    %c0_i32 = arith.constant 0 : i32
    %c0_i32_0 = arith.constant 0 : i32
    return %c0_i32, %arg1 : i32, i32
  }
  func.func @transform_3(%arg0: i32, %arg1: i32) -> (i32, i32) {
    %c0_i32 = arith.constant 0 : i32
    return %arg0, %arg1 : i32, i32
  }
}

</mosaic_0001>

<bundles_post_ra>
// kernel: tpu_custom_call.1
= control target key start
LH: loop header
LB: loop body
LE: loop exit
PB: predicated region body
PF: predicated region fallthrough
CT: control target
= control target key end

     0   :  { %8 = vsyncpa [#allocation3], 0  ;;  %s1217_s0 = inlined_call_operand.hbm [shape: bf16[32,256], index: 0, kind: input, shape index: {}]   ;;  %s1218_s1 = inlined_call_operand.hbm [shape: bf16[256,256], index: 1, kind: input, shape index: {}]   ;;  %s1219_s2 = inlined_call_operand.vmem [shape: f32[1,256], index: 2, kind: input, shape index: {}]   ;;  %s1220_s3 = inlined_call_operand.hbm [shape: bf16[32,256], index: 3, kind: output, shape index: {}]  }
   0x1   :  { %9 = vsyncpa [#allocation6], 0 }
   0x2   :  { %11 = vsyncpa [#allocation6 + $0x1], 0 }
   0x3   :  { %12 = vsyncpa [#allocation4], 0 }
   0x4   :  { %14 = vsyncpa [#allocation4 + $0x1], 0  ;;  %s970_s12 = smov 0   ;;  %s972_s13 = smov 0  }
   0x5   :  { %s974_s14 = smov 0   ;;  %s976_s15 = smov 0  }
   0x6   :  { %s978_s16 = smov 0   ;;  %s980_s17 = smov 0  }
   0x7 LB: > { %s593_s18 = sadd.s32 4294967295, %s938_s17   ;;  %s594_s19 = sadd.s32 4294967294, %s938_s17   ;;  %s938_s17 = sphi %s980_s17, %s20_s17   ;;  %s934_s16 = sphi %s978_s16, %s1246_s16   ;;  %s930_s15 = sphi %s976_s15, %s1245_s15   ;;  %s926_s14 = sphi %s974_s14, %s1244_s14   ;;  %s922_s13 = sphi %s972_s13, %s1243_s13   ;;  %s918_s12 = sphi %s970_s12, %s1242_s12  }
   0x8   : > { %p72_p0 = scmp.ne.s32.totalorder %s926_s14, %s922_s13  ;;  %p73_p1 = scmp.eq.s32.totalorder %s938_s17, 0 }
   0x9   : > { %p78_p2 = scmp.ne.s32.totalorder %s922_s13, %s918_s12  ;;  %p1007_p3 = scmp.eq.s32.totalorder %s593_s18, 0 }
   0xa   : > { %p1011_p4 = por %p73_p1, %p72_p0  ;;  %p130_p5 = scmp.eq.s32.totalorder %s593_s18, 1 }
   0xb   : > { %s1227_s20 = scalar_select %p1007_p3, 1, 0 }
   0xc   : > { %p1017_p6 = por %p1007_p3, %p78_p2  ;;  %p136_p7 = scmp.eq.s32.totalorder %s594_s19, 1 }
   0xd   : > { %p1021_p8 = por %p130_p5, %p72_p0  ;;  %p595_p9 = scmp.ge.s32.totalorder %s938_s17, 1 }
   0xe   : > { %s1229_s22 = scalar_select %p1017_p6, 1, 0 }
   0xf   : > { %s1230_s23 = scalar_select %p1021_p8, 1, 0 }
  0x10   : > { %p1026_p10 = por %p136_p7, %p78_p2  ;;  %p143_p11 = scmp.lt.s32.totalorder %s938_s17, 3 }
  0x11   : > { %s940_s26 = smov [#allocation2]   ;;  %p713_p1 = scmp.lt.s32.totalorder %s938_s17, 2 }
  0x12   : > { %s1231_s24 = scalar_select %p1026_p10, 1, 0 }
  0x13   : > { %p1031_p12 = pnand %p595_p9, %p143_p11  ;;  %s159_s27 = sshll.u32 %s940_s26, 4  ;;  %s1035_s27 = int_to_ptr.vmem [resolvable:$true] %s159_s27 }
  0x14   : > { %p1049_p2 = pnand %p713_p1, %p1011_p4  ;;  %s29_s30 = sadd.s32 1, %s934_s16 }
  0x15   : > { %s1232_s25 = scalar_select %p1031_p12, 1, 0 }
  0x16   : > { %p700_p13 = pneg %p1031_p12  ;;  %s794_s6 = scalar_lea.hbm %s1217_s0, 512 }
  0x17   : > { %s1234_s29 = scalar_select %p1049_p2, 1, 0 }
  0x18   : > { %p1043_p5 = pnand %p700_p13, %p1007_p3  ;;  %p795_p7 = scmp.ne.s32.totalorder %s1217_s0, %s794_s6 }
  0x19   : > { %p801_p4 = scmp.lt.u32.totalorder %s794_s6, %s1217_s0 }
  0x1a   : > { %p796_p9 = pneg %p1043_p5 }
  0x1c   : > { %p797_p11 = pnand %p796_p9, %p795_p7 }
  0x1e   : > { %p798_p13 = pneg %p797_p11 }
  0x20   : > { %p803_p1 = pnand %p801_p4, %p798_p13 }
  0x22   : > { %806 = shalt.err (!%p803_p1)
}
  0x23   : > { %s807_s11 = scalar_lea.vmem %s1035_s27, 512  ;;  %p815_p6 = scmp.lt.s32.totalorder %s1035_s27, %s1035_s27 }
  0x24   : > { %p808_p0 = scmp.ne.s32.totalorder %s1035_s27, %s807_s11  ;;  %p816_p3 = scmp.lt.s32.totalorder %s807_s11, %s807_s11 }
  0x26   : > { %p810_p10 = pnand %p808_p0, %p796_p9  ;;  %p817_p12 = por %p816_p3, %p815_p6 }
  0x28   : > { %p811_p8 = pneg %p810_p10 }
  0x2a   : > { %p818_p2 = pnand %p817_p12, %p811_p8 }
  0x2c   : > { %821 = shalt.err (!%p818_p2)
}
  0x2d   : > { %s941_s18 = smov 128   ;;  %s942_s19 = smov 8  }
  0x2e   : > { %703 = dma.hbm_to_vmem [thread:$0]  (!%p1043_p5), %s1217_s0, 512, %s1035_s27, [#allocation3], %s941_s18, %s941_s18, %s942_s19  }
  0x2f   : > { %p30_p10 = scmp.ge.s32.totalorder %s29_s30, 2  ;;  %s65_s4 = sadd.s32 1, %s926_s14 }
  0x30   : > { %s173_s5 = sand.u32 1, %s926_s14   ;;  %s599_s8 = sshll.u32 %s934_s16, 6 }
  0x31   : > { %s1248_s30 = smov (%p30_p10, %s29_s30), 0  ;;  %s598_s6 = sshll.u32 %s173_s5, 7 }
  0x32   : > { %s62_s7 = ssub.s32 %s934_s16, %s1248_s30  ;;  %s1087_s10 = scalar_lea.hbm %s1218_s1, %s599_s8 }
  0x33   : > { %p63_p3 = scmp.eq.s32.totalorder %s62_s7, 0  ;;  %s177_s27 = scalar_lea.vmem [#allocation5], %s598_s6 }
  0x34   : > { %s183_s11 = sshll.u32 %s177_s27, 4  ;;  %s1094_s21 = scalar_lea.sflag [#allocation6], %s173_s5  ;;  %s1092_s11 = int_to_ptr.vmem [resolvable:$true] %s183_s11 }
  0x35   : > { %s1090_s19 = scalar_select %p63_p3, %s926_s14, %s65_s4  }
  0x36   : > { %s822_s26 = scalar_lea.hbm %s1087_s10, 2048  ;;  %p1235_p8 = scmp.ne.s32.totalorder %s1234_s29, 0 }
  0x37   : > { %p823_p6 = scmp.ne.s32.totalorder %s1087_s10, %s822_s26  ;;  %s827_s9 = scalar_lea.hbm %s1218_s1, 4096 }
  0x38   : > { %p824_p12 = pneg %p1235_p8  ;;  %p828_p2 = scmp.lt.u32.totalorder %s1087_s10, %s1218_s1 }
  0x39   : > { %p829_p7 = scmp.lt.u32.totalorder %s827_s9, %s822_s26  ;;  %p831_p11 = scmp.lt.u32.totalorder %s822_s26, %s1087_s10 }
  0x3a   : > { %p825_p0 = pnand %p824_p12, %p823_p6 }
  0x3b   : > { %p830_p9 = por %p829_p7, %p828_p2 }
  0x3c   : > { %p826_p5 = pneg %p825_p0 }
  0x3d   : > { %p832_p13 = por %p831_p11, %p830_p9 }
  0x3f   : > { %p833_p4 = pnand %p832_p13, %p826_p5 }
  0x41   : > { %836 = shalt.err (!%p833_p4)
}
  0x42   : > { %s837_s4 = scalar_lea.vmem %s1092_s11, 2048  ;;  %s943_s5 = smov [#allocation5]  }
  0x43   : > { %p838_p1 = scmp.ne.s32.totalorder %s1092_s11, %s837_s4  ;;  %s842_s27 = sshll.u32 %s943_s5, 4  ;;  %s843_s27 = int_to_ptr.vmem [resolvable:$false] %s842_s27 }
  0x44   : > { %s844_s7 = scalar_lea.vmem %s843_s27, 4096  ;;  %p845_p6 = scmp.lt.s32.totalorder %s1092_s11, %s843_s27 }
  0x45   : > { %p840_p10 = pnand %p838_p1, %p824_p12  ;;  %p846_p0 = scmp.lt.s32.totalorder %s844_s7, %s837_s4 }
  0x47   : > { %p841_p3 = pneg %p840_p10  ;;  %p847_p2 = por %p846_p0, %p845_p6 }
  0x49   : > { %p848_p7 = pnand %p847_p2, %p841_p3 }
  0x4b   : > { %851 = shalt.err (!%p848_p7)
}
  0x4c   : > { %s944_s26 = smov 64   ;;  %s945_s8 = smov 4  }
  0x4d   : > { %707 = dma.hbm_to_vmem [thread:$0]  (!%p1235_p8), %s1087_s10, 2048, %s1092_s11, %s1094_s21, %s941_s18, %s944_s26, %s945_s8  }
  0x4e   : > { %p1236_p12 = scmp.ne.s32.totalorder %s1232_s25, 0 }
  0x4f   : > { %p1237_p5 = scmp.ne.s32.totalorder (!%p1236_p12), %s1227_s20, 0 }
  0x50   : > { %201 = sbr.rel (%p1236_p12) target bundleno = 362 (0x16a), region = 32 }
  0x57   : > { %905 = dma.done.wait (%p1237_p5), [#allocation3], 512  }
  0x58   : > { %907 = vsyncadd (%p1237_p5), [#allocation3], 4294966784  ;;  %s1130_s9 = sand.u32 1, %s922_s13   ;;  %p1238_p8 = scmp.ne.s32.totalorder %s1229_s22, 0 }
  0x59   : > { %s602_s6 = sshll.u32 %s1130_s9, 7  ;;  %s208_s28 = scalar_lea.sflag [#allocation6], %s1130_s9 }
  0x5a   : > { %s1134_s29 = scalar_lea.vmem [#allocation5], %s602_s6 }
  0x5b   : > { %909 = dma.done.wait (%p1238_p8), %s208_s28, 2048  }
  0x5c   : > { %911 = vsyncadd (%p1238_p8), %s208_s28, 4294965248  ;;  %v772_v0 = vld [vmem:[%s1134_s29 + $0x40] sm:$0xff]   ;;  %v774_v2 = vld [vmem:[%s1134_s29 + $0x48] sm:$0xff]   ;;  %p238_p9 = scmp.lt.s32.totalorder %s930_s15, 1  ;;  %s603_s22 = sshll.u32 %s1130_s9, 4 }
  0x5d   : > { %v773_v1 = vld [vmem:[%s1134_s29] sm:$0xff]   ;;  %648 = vmatprep.subr.bf16.mxu0 %v772_v0  ;;  %676 = vmatprep.subr.bf16.mxu1 %v772_v0  ;;  %v775_v3 = vld [vmem:[%s1134_s29 + $0x8] sm:$0xff]   ;;  %v776_v4 = vld [vmem:[%s1134_s29 + $0x50] sm:$0xff]   ;;  %s236_s11 = scalar_lea.vmem [#allocation7], %s603_s22  ;;  %s630_s4 = sshll.u32 %s930_s15, 6 }
  0x5e   : > { %649 = vmatpush3.bf16.msra.mxu0 %v773_v1  ;;  %684 = vmatpush3.bf16.msra.mxu1 %v773_v1  ;;  %v777_v5 = vld [vmem:[%s1134_s29 + $0x10] sm:$0xff]   ;;  %v778_v6 = vld [vmem:[%s1134_s29 + $0x58] sm:$0xff]   ;;  %v780_v8 = vld [vmem:[%s1134_s29 + $0x60] sm:$0xff]   ;;  %s239_s20 = scalar_select %p238_p9, %s930_s15, 1 }
  0x5f   : > { %650 = vmatprep.subr.bf16.mxu0 %v774_v2  ;;  %677 = vmatprep.subr.bf16.mxu1 %v774_v2  ;;  %v779_v7 = vld [vmem:[%s1134_s29 + $0x18] sm:$0xff]   ;;  %v781_v9 = vld [vmem:[%s1134_s29 + $0x20] sm:$0xff]   ;;  %v782_v10 = vld [vmem:[%s1134_s29 + $0x68] sm:$0xff]   ;;  %s487_s21 = sshll.u32 %s236_s11, 4  ;;  %s1168_s7 = scalar_lea.hbm %s1220_s3, %s630_s4  ;;  %s1163_s21 = int_to_ptr.vmem [resolvable:$true] %s487_s21 }
  0x60   : > { %v790_v11 = vld [vmem:[#allocation2 + $0x4] ss:$8 sps:$4 sm:$0xff]   ;;  %v793_v12 = vld [vmem:[#allocation2 + $0x14] ss:$8 sps:$4 sm:$0xff]   ;;  %v788_v18 = vld [vmem:[#allocation2] ss:$8 sps:$4 sm:$0xff]   ;;  %s240_s10 = scalar_lea.vmem %s1219_s2, %s239_s20 }
  0x61   : > { %v783_v13 = vld [vmem:[%s1134_s29 + $0x28] sm:$0xff]   ;;  %v784_v14 = vld [vmem:[%s1134_s29 + $0x70] sm:$0xff]   ;;  %434 = vmatprep.mubr.bf16.mxu0 %v790_v11  ;;  %442 = vmatprep.mubr.bf16.mxu1 %v793_v12  ;;  %v786_v16 = vld [vmem:[%s1134_s29 + $0x78] sm:$0xff]   ;;  %s472_s26 = scalar_lea.sflag [#allocation4], %s1130_s9  ;;  %s852_s15 = scalar_lea.vmem %s1163_s21, 256 }
  0x62   : > { %651 = vmatpush3.bf16.msra.mxu0 %v775_v3  ;;  %685 = vmatpush3.bf16.msra.mxu1 %v775_v3  ;;  %v785_v15 = vld [vmem:[%s1134_s29 + $0x30] sm:$0xff]   ;;  %v787_v17 = vld [vmem:[%s1134_s29 + $0x38] sm:$0xff]   ;;  %v604_v28 = vld [vmem:[%s240_s10] ss:$0 sm:$0xff]  ;;  %p853_p11 = scmp.ne.s32.totalorder %s1163_s21, %s852_s15  ;;  %p1239_p13 = scmp.ne.s32.totalorder %s1230_s23, 0 }
  0x63   : > { %652 = vmatprep.subr.bf16.mxu0 %v776_v4  ;;  %678 = vmatprep.subr.bf16.mxu1 %v776_v4  ;;  %v791_v19 = vld [vmem:[#allocation2 + $0x10] ss:$8 sps:$4 sm:$0xff]   ;;  %s946_s8 = smov [#allocation7]  }
  0x64   : > { %p854_p4 = pnand %p853_p11, %p1239_p13  ;;  %s856_s6 = sshll.u32 %s946_s8, 4  ;;  %s857_s6 = int_to_ptr.vmem [resolvable:$false] %s856_s6 }
  0x65   : > { %s858_s28 = scalar_lea.vmem %s857_s6, 512  ;;  %p859_p10 = scmp.lt.s32.totalorder %s1163_s21, %s857_s6 }
  0x66   : > { %653 = vmatpush3.bf16.msra.mxu0 %v777_v5  ;;  %686 = vmatpush3.bf16.msra.mxu1 %v777_v5  ;;  %p855_p1 = pneg %p854_p4  ;;  %p860_p3 = scmp.lt.s32.totalorder %s858_s28, %s852_s15 }
  0x67   : > { %654 = vmatprep.subr.bf16.mxu0 %v778_v6  ;;  %679 = vmatprep.subr.bf16.mxu1 %v778_v6 }
  0x68   : > { %p861_p6 = por %p860_p3, %p859_p10 }
  0x6a   : > { %655 = vmatpush3.bf16.msra.mxu0 %v779_v7  ;;  %687 = vmatpush3.bf16.msra.mxu1 %v779_v7  ;;  %p862_p0 = pnand %p861_p6, %p855_p1 }
  0x6b   : > { %656 = vmatprep.subr.bf16.mxu0 %v780_v8  ;;  %680 = vmatprep.subr.bf16.mxu1 %v780_v8 }
  0x6e   : > { %657 = vmatpush3.bf16.msra.mxu0 %v781_v9  ;;  %688 = vmatpush3.bf16.msra.mxu1 %v781_v9 }
  0x6f   : > { %658 = vmatprep.subr.bf16.mxu0 %v782_v10  ;;  %681 = vmatprep.subr.bf16.mxu1 %v782_v10 }
  0x72   : > { %659 = vmatpush3.bf16.msra.mxu0 %v783_v13  ;;  %689 = vmatpush3.bf16.msra.mxu1 %v783_v13 }
  0x73   : > { %660 = vmatprep.subr.bf16.mxu0 %v784_v14  ;;  %682 = vmatprep.subr.bf16.mxu1 %v784_v14 }
  0x76   : > { %661 = vmatpush3.bf16.msra.mxu0 %v785_v15  ;;  %690 = vmatpush3.bf16.msra.mxu1 %v785_v15 }
  0x77   : > { %662 = vmatprep.subr.bf16.mxu0 %v786_v16  ;;  %683 = vmatprep.subr.bf16.mxu1 %v786_v16 }
  0x7a   : > { %663 = vmatpush3.bf16.msra.mxu0 %v787_v17  ;;  %691 = vmatpush3.bf16.msra.mxu1 %v787_v17 }
  0x7d   : > { %435 = vmatmul.mubr.bf16.vlgmr.msra.gmra.mrb[0].mxu0 %v788_v18  ;;  %443 = vmatmul.mubr.bf16.vlgmr.msra.gmra.mrb[0].mxu1 %v791_v19 }
 0x150   : > { %v664_v20 = vpop.f32.mrb[0].mxu0  ;;  %v670_v21 = vpop.f32.mrb[0].mxu1 }
 0x151   : > { %v665_v22 = vpop.f32.mrb[1].mxu0  ;;  %v671_v23 = vpop.f32.mrb[1].mxu1 }
 0x152   : > { %v666_v24 = vadd.f32 %v665_v22, %v664_v20  ;;  %v672_v25 = vadd.f32 %v671_v23, %v670_v21  ;;  %v667_v26 = vpop.f32.mrb[2].mxu0  ;;  %v673_v27 = vpop.f32.mrb[2].mxu1 }
 0x153   : > { %v668_v29 = vpop.f32.mrb[3].mxu0  ;;  %v674_v30 = vpop.f32.mrb[3].mxu1 }
 0x154   : > { %v669_v31 = vadd.f32 %v668_v29, %v667_v26  ;;  %v675_v32 = vadd.f32 %v674_v30, %v673_v27  ;;  %v437_v33 = vadd.f32 %v666_v24, %v604_v28  ;;  %v445_v34 = vadd.f32 %v672_v25, %v604_v28 }
 0x156   : > { %v440_v35 = vadd.f32 %v669_v31, %v604_v28  ;;  %v448_v36 = vadd.f32 %v675_v32, %v604_v28 }
 0x158   : > { %v640_v37 = vpack.c.bf16 %v440_v35, %v437_v33  ;;  %v645_v38 = vpack.c.bf16 %v448_v36, %v445_v34 }
 0x15a   : > { %641 = vst [vmem:[%s236_s11] sm:$0xff] %v640_v37   ;;  %647 = vst [vmem:[%s236_s11 + $0x8] sm:$0xff] %v645_v38  }
 0x15b   : > { %865 = shalt.err (!%p862_p0)
}
 0x15c   : > { %s866_s29 = scalar_lea.hbm %s1168_s7, 256  ;;  %s870_s25 = scalar_lea.hbm %s1220_s3, 512 }
 0x15d   : > { %p867_p2 = scmp.ne.s32.totalorder %s1168_s7, %s866_s29  ;;  %p871_p5 = scmp.lt.u32.totalorder %s1168_s7, %s1220_s3 }
 0x15e   : > { %p872_p8 = scmp.lt.u32.totalorder %s870_s25, %s866_s29  ;;  %p874_p11 = scmp.lt.u32.totalorder %s866_s29, %s1168_s7 }
 0x15f   : > { %p868_p7 = pnand %p867_p2, %p1239_p13 }
 0x160   : > { %p873_p9 = por %p872_p8, %p871_p5 }
 0x161   : > { %p869_p12 = pneg %p868_p7 }
 0x162   : > { %p875_p4 = por %p874_p11, %p873_p9 }
 0x164   : > { %p876_p1 = pnand %p875_p4, %p869_p12 }
 0x166   : > { %879 = shalt.err (!%p876_p1)
}
 0x167   : > { %s947_s11 = smov 64   ;;  %s948_s4 = smov 128  }
 0x168   : > { %s949_s5 = smov 4  }
 0x169   : > { %698 = dma.vmem_to_hbm [thread:$0]  (%p1239_p13), %s1163_s21, 256, %s1168_s7, %s472_s26, %s947_s11, %s948_s4, %s949_s5  }
 0x16a PF: > { %s502_s27 = sand.u32 1, %s918_s12   ;;  %p1240_p10 = scmp.ne.s32.totalorder %s1231_s24, 0 }
 0x16b   : > { %p1241_p3 = scmp.ge.s32.totalorder %s938_s17, 2  ;;  %s503_s15 = scalar_lea.sflag [#allocation4], %s502_s27 }
 0x16d   : > { %p709_p6 = pnand %p1241_p3, %p1240_p10 }
 0x16f   : > { %913 = dma.done.wait (!%p709_p6), %s503_s15, 256  }
 0x170   : > { %915 = vsyncadd (!%p709_p6), %s503_s15, 4294967040  ;;  %s20_s17 = sadd.s32 1, %s938_s17   ;;  %s1242_s12 = smov %s922_s13 }
 0x171   : > { %p17_p0 = scmp.ge.s32.totalorder %s20_s17, 4   ;;  %s1243_s13 = smov %s926_s14 }
 0x172   : > { %s1244_s14 = smov %s1090_s19  ;;  %s1245_s15 = smov %s934_s16 }
 0x173   : > { %s1246_s16 = smov %s1248_s30  ;;  %19 = sbr.rel (!%p17_p0) target bundleno = 7 (0x7), region = 86 }
 0x17a   :  { %508 = vsyncpa [#allocation3], 1 }
 0x17b   :  { %510 = vsyncpa [#allocation3 + $0x1], 1 }
 0x17c   :  { %511 = vsyncpa [#allocation6], 1 }
 0x17d   :  { %513 = vsyncpa [#allocation6 + $0x1], 1 }
 0x17e   :  { %514 = vsyncpa [#allocation4], 1 }
 0x17f   :  { %516 = vsyncpa [#allocation4 + $0x1], 1 }

</bundles_post_ra>
